<compile_context>
chip_gen: v7x
topology: tpu7x:2x2x1
jax: 0.10.0
libtpu: 0.0.40
codegen_flags: <defaults>
</compile_context>

<pallas_src>
import functools

import jax
import jax.numpy as jnp
from jax.experimental import pallas as pl
from jax.experimental.pallas import tpu as pltpu


_VMEM_LIMIT = 48 * 1024 * 1024   # below v7x's 64 MiB physical VMEM, above scoped default
_NEG_INIT = -1e30                # online-softmax running-max init (exp(-1e30) == 0.0)
_EDW = 128                       # lane-dense width for the per-head dst scores e_dst


# ----------------------------------- small helpers -------------------------------------
def _round_up(v, m):
    return ((v + m - 1) // m) * m


def _pick_block(n_pad, target, min_tiles=1):
    """Largest multiple of 128 <= target dividing n_pad, leaving >= min_tiles tiles."""
    cap = max(128, (n_pad // min_tiles) // 128 * 128)
    b = max(128, min(target, cap, n_pad) // 128 * 128)
    while n_pad % b:
        b -= 128
    return b


def _head_block_weight(w, nheads, dout, dpad, in_pad=None):
    """w [fin, H*dout] -> [fin_pad, H*dpad]: head h's columns at [h*dpad : h*dpad+dout]."""
    fin = w.shape[0]
    rows = in_pad if in_pad is not None else fin
    out = jnp.zeros((rows, nheads * dpad), w.dtype)
    for h in range(nheads):
        out = out.at[:fin, h * dpad:h * dpad + dout].set(w[:, h * dout:(h + 1) * dout])
    return out


def _ones_cols(nheads, dout, dpad, dtype):
    """Indicator row: 1.0 at each head's ones-column position (lane h*dpad+dout)."""
    v = jnp.zeros((1, nheads * dpad), dtype)
    for h in range(nheads):
        v = v.at[0, h * dpad + dout].set(1.0)
    return v


def _att_dst_matrix(a, dpad, edw):
    """a [H, dout] -> [H*dpad, edw]: rows h*dpad..+dout of column h hold a[h]."""
    nheads, dout = a.shape
    m = jnp.zeros((nheads * dpad, edw), a.dtype)
    for h in range(nheads):
        m = m.at[h * dpad:h * dpad + dout, h].set(a[h])
    return m


def _att_srcT_matrix(a, dpad):
    """a [H, dout] -> [H, H*dpad]: row h, cols h*dpad..+dout hold a[h]."""
    nheads, dout = a.shape
    m = jnp.zeros((nheads, nheads * dpad), a.dtype)
    for h in range(nheads):
        m = m.at[h, h * dpad:h * dpad + dout].set(a[h])
    return m


def _tile_flags(adj8, block_d, block_s):
    """Per-(dst_tile, src_tile) occupancy flags, flattened 1D int32 for SMEM prefetch."""
    n_pad = adj8.shape[0]
    nd, ns = n_pad // block_d, n_pad // block_s
    t = adj8.reshape(nd, block_d, ns, block_s).astype(jnp.int32)
    return (t.sum(axis=(1, 3)) > 0).astype(jnp.int32).reshape(-1)


def edge_index_to_adj(edge_idx, num_nodes, n_pad=None):
    """Densify edge_index [2, E] (src, dst) into adj[dst, src] with self-loops.
    NOTE: densification dedups multi-edges (differs from torch_geometric for multigraphs)."""
    if n_pad is None:
        n_pad = num_nodes
    src, dst = edge_idx[0], edge_idx[1]
    adj = jnp.zeros((n_pad, n_pad), jnp.float32)
    adj = adj.at[dst, src].set(1.0)
    idx = jnp.arange(n_pad)
    adj = adj.at[idx, idx].set(1.0)   # GATConv add_self_loops=True (padded rows get only
    return adj                        # a self-loop -> finite values that are sliced off)


# ----------------------- kernel 1: projection + fused attention scores -----------------
def _project_kernel(x_ref, w_ref, one_ref, adst_ref, asrcT_ref, z_ref, ed_ref, esT_ref):
    # z = x @ W_aug (GATConv.lin, no bias) on the MXU, f32 accumulation.  W_aug places
    # head h's d_out columns at lanes [h*dpad : h*dpad+dout] and zeros elsewhere.
    z = jnp.dot(x_ref[...], w_ref[...], preferred_element_type=jnp.float32)
    z_c = z.astype(z_ref.dtype)
    # z_aug: per-head [z_h | 1 | 0pad]; ones column added via the precomputed indicator
    # row (single full-width store, no per-head lane writes).
    z_ref[...] = z_c + one_ref[...]
    # Fused per-head scores (lane-dense [*, 128] e_dst output: head h score in lane h).
    ed_ref[...] = jnp.dot(z_c, adst_ref[...], preferred_element_type=jnp.float32)
    # e_src stored pre-transposed as [H, tile] so the attention kernel broadcasts a
    # [1, tile_src] row per head with no per-step transpose.
    esT_ref[...] = jax.lax.dot_general(
        asrcT_ref[...], z_c, (((1,), (1,)), ((), ())),
        preferred_element_type=jnp.float32)


def _project(x, w_aug, onecols, a_dst, a_srcT, *, block):
    n_pad, fin = x.shape
    hdp = w_aug.shape[1]
    nheads = a_srcT.shape[0]
    edw = a_dst.shape[1]
    return pl.pallas_call(
        _project_kernel,
        grid=(n_pad // block,),
        in_specs=[
            pl.BlockSpec((block, fin), lambda i: (i, 0)),
            pl.BlockSpec((fin, hdp), lambda i: (0, 0)),
            pl.BlockSpec((1, hdp), lambda i: (0, 0)),
            pl.BlockSpec((hdp, edw), lambda i: (0, 0)),
            pl.BlockSpec((nheads, hdp), lambda i: (0, 0)),
        ],
        out_specs=[
            pl.BlockSpec((block, hdp), lambda i: (i, 0)),
            pl.BlockSpec((block, edw), lambda i: (i, 0)),
            pl.BlockSpec((nheads, block), lambda i: (0, i)),
        ],
        out_shape=[
            jax.ShapeDtypeStruct((n_pad, hdp), x.dtype),          # z_aug (compute dtype)
            jax.ShapeDtypeStruct((n_pad, edw), jnp.float32),      # e_dst (lane-dense)
            jax.ShapeDtypeStruct((nheads, n_pad), jnp.float32),   # e_src (transposed)
        ],
        compiler_params=pltpu.CompilerParams(
            dimension_semantics=("parallel",),
            vmem_limit_bytes=_VMEM_LIMIT),
    )(x, w_aug, onecols, a_dst, a_srcT)


# ----------------------- kernel 2: masked attention + aggregation (online softmax) -----
def _attn_kernel(cnt_ref, ed_ref, esT_ref, z_ref, adj_ref, b_ref, out_ref,
                 m_sc, acc_sc, *, nheads, dout, dpad, nclass, average):
    i = pl.program_id(0)
    j = pl.program_id(1)
    nj = pl.num_programs(1)

    @pl.when(j == 0)
    def _init():
        m_sc[...] = jnp.full_like(m_sc, _NEG_INIT)
        acc_sc[...] = jnp.zeros_like(acc_sc)

    # Empty-tile skip: adjacency occupancy flag from SMEM scalar prefetch.
    @pl.when(cnt_ref[i * nj + j] > 0)
    def _body():
        adj = adj_ref[...].astype(jnp.float32)     # {0,1}; int8 storage, f32 math
        ed = ed_ref[...]                           # [td, 128] f32, head h score in lane h
        esT = esT_ref[...]                         # [H, ts]   f32
        z = z_ref[...]                             # [ts, H*dpad]; per-head [z_h | 1 | 0]

        # Static unroll over heads (static lane offsets).
        # TODO(synk): switch to lax.fori_loop + pl.ds slices if the bundle dump shows
        # register spills from the unbounded live ranges of the unrolled temporaries.
        for h in range(nheads):
            lo = h * dpad
            raw = ed[:, h:h + 1] + esT[h:h + 1, :]            # [td, ts]
            logit = jnp.maximum(raw, 0.2 * raw)               # LeakyReLU(0.2): mul + max
            m_prev = m_sc[:, h:h + 1]
            m_new = jnp.maximum(m_prev, jnp.max(logit, axis=1, keepdims=True))
            # Multiplicative masking only; m_new is an upper bound over the row so the
            # exp arguments are <= 0 (bias add dropped).
            p = jnp.exp(logit - m_new) * adj                  # unnormalized attention
            corr = jnp.exp(m_prev - m_new)
            m_sc[:, h:h + 1] = m_new
            # Aggregation on the MXU; the trailing ones column of z_h makes the matmul
            # also return the softmax row-sum (online l) in lane lo+dout.
            contrib = jnp.dot(p.astype(z.dtype), z[:, lo:lo + dpad],
                              preferred_element_type=jnp.float32)
            acc_sc[:, lo:lo + dpad] = corr * acc_sc[:, lo:lo + dpad] + contrib

    @pl.when(j == nj - 1)
    def _finalize():
        td = out_ref.shape[0]
        if average:
            # concat=False: mean over heads, bias, log_softmax over the real classes.
            acc = None
            for h in range(nheads):
                lo = h * dpad
                inv = 1.0 / acc_sc[:, lo + dout:lo + dout + 1]   # exact: feeds log_softmax
                head = acc_sc[:, lo:lo + dout] * inv
                acc = head if acc is None else acc + head
            h2 = acc * (1.0 / nheads) + b_ref[...]               # [td, nclass]
            m2 = jnp.max(h2, axis=1, keepdims=True)
            s = h2 - m2
            logp = s - jnp.log(jnp.sum(jnp.exp(s), axis=1, keepdims=True))
            out_ref[:, :nclass] = logp.astype(out_ref.dtype)
            pad_w = out_ref.shape[1] - nclass                    # lane-dense output slab
            if pad_w:
                out_ref[:, nclass:] = jnp.zeros((td, pad_w), out_ref.dtype)
        else:
            # concat=True: per-head normalization, bias, ReLU, lane-dense padded output.
            b = b_ref[...]
            for h in range(nheads):
                lo = h * dpad
                o = h * dout
                inv = 1.0 / acc_sc[:, lo + dout:lo + dout + 1]
                val = acc_sc[:, lo:lo + dout] * inv + b[:, o:o + dout]
                out_ref[:, o:o + dout] = jnp.maximum(val, 0.0).astype(out_ref.dtype)
            pad_w = out_ref.shape[1] - nheads * dout
            if pad_w:
                out_ref[:, nheads * dout:] = jnp.zeros((td, pad_w), out_ref.dtype)


def _attention(flags, e_dst, e_srcT, z_aug, adj, b, *, nheads, dout, dpad, nclass,
               average, out_width, out_dtype, block_d, block_s):
    n_pad, hdp = z_aug.shape
    edw = e_dst.shape[1]
    kernel = functools.partial(_attn_kernel, nheads=nheads, dout=dout, dpad=dpad,
                               nclass=nclass, average=average)
    return pl.pallas_call(
        kernel,
        grid_spec=pltpu.PrefetchScalarGridSpec(
            num_scalar_prefetch=1,
            grid=(n_pad // block_d, n_pad // block_s),
            in_specs=[
                pl.BlockSpec((block_d, edw), lambda i, j, cnt: (i, 0)),     # e_dst
                pl.BlockSpec((nheads, block_s), lambda i, j, cnt: (0, j)),  # e_src^T
                pl.BlockSpec((block_s, hdp), lambda i, j, cnt: (j, 0)),     # z_aug
                pl.BlockSpec((block_d, block_s), lambda i, j, cnt: (i, j)), # adj (int8)
                pl.BlockSpec((1, b.shape[1]), lambda i, j, cnt: (0, 0)),    # bias
            ],
            out_specs=pl.BlockSpec((block_d, out_width), lambda i, j, cnt: (i, 0)),
            scratch_shapes=[
                pltpu.VMEM((block_d, nheads), jnp.float32),   # running max (per head)
                pltpu.VMEM((block_d, hdp), jnp.float32),      # unnormalized agg + row-sums
            ]),
        out_shape=jax.ShapeDtypeStruct((n_pad, out_width), out_dtype),
        compiler_params=pltpu.CompilerParams(
            dimension_semantics=("parallel", "arbitrary"),
            vmem_limit_bytes=_VMEM_LIMIT),
    )(flags, e_dst, e_srcT, z_aug, adj, b)


# ----------------------------------- wrapper / glue -----------------------------------
def gat_forward(x, edge_idx, params, *, nheads, nhid, nclass,
                compute_dtype=jnp.float32, block_d=512, block_s=1024):
    n, nfeat = x.shape
    d1 = nhid // nheads
    cdt = compute_dtype

    n_pad = _round_up(max(n, 128), 128)
    block_d = _pick_block(n_pad, block_d, min_tiles=2)   # keep >= 2 dst tiles (v7x 2 TCs)
    block_s = _pick_block(n_pad, block_s)
    c_pad = _round_up(nclass, 128)                       # lane-dense final output width
    h1_width = _round_up(nheads * d1, 128)               # lane-dense layer-1 output width
    dpad1 = _round_up(d1 + 1, 8)                         # per-head block: [feat | 1 | 0pad]
    dpad2 = _round_up(nclass + 1, 8)

    x_p = jnp.zeros((n_pad, nfeat), cdt).at[:n, :].set(x.astype(cdt))
    adj8 = edge_index_to_adj(edge_idx, n, n_pad).astype(jnp.int8)   # O(N^2) stream: int8
    flags = _tile_flags(adj8, block_d, block_s)                     # SMEM scalar prefetch

    # Parameter prep (host-side, once): head-block weight layout + fused score matrices.
    w1a = _head_block_weight(params["w1"].astype(cdt), nheads, d1, dpad1)
    one1 = _ones_cols(nheads, d1, dpad1, cdt)
    ad1 = _att_dst_matrix(params["ad1"].astype(cdt), dpad1, _EDW)
    as1T = _att_srcT_matrix(params["as1"].astype(cdt), dpad1)
    b1p = jnp.zeros((1, h1_width), jnp.float32).at[:, :nheads * d1].set(
        params["b1"].astype(jnp.float32))

    w2a = _head_block_weight(params["w2"].astype(cdt), nheads, nclass, dpad2,
                             in_pad=h1_width)            # rows padded -> consumes h1 as-is
    one2 = _ones_cols(nheads, nclass, dpad2, cdt)
    ad2 = _att_dst_matrix(params["ad2"].astype(cdt), dpad2, _EDW)
    as2T = _att_srcT_matrix(params["as2"].astype(cdt), dpad2)
    b2 = params["b2"].astype(jnp.float32)

    # ---- layer 1: heads concatenated, bias, ReLU (lane-dense padded output) ----
    z1, ed1, es1T = _project(x_p, w1a, one1, ad1, as1T, block=block_d)
    h1 = _attention(flags, ed1, es1T, z1, adj8, b1p, nheads=nheads, dout=d1, dpad=dpad1,
                    nclass=nclass, average=False, out_width=h1_width, out_dtype=cdt,
                    block_d=block_d, block_s=block_s)
    # TODO(synk): F.dropout implemented as identity (inference, training=False).

    # ---- layer 2: heads averaged, bias, log_softmax (lane-dense padded output) ----
    z2, ed2, es2T = _project(h1, w2a, one2, ad2, as2T, block=block_d)
    out_p = _attention(flags, ed2, es2T, z2, adj8, b2, nheads=nheads, dout=nclass,
                       dpad=dpad2, nclass=nclass, average=True, out_width=c_pad,
                       out_dtype=jnp.float32, block_d=block_d, block_s=block_s)
    return out_p[:n, :nclass]


# ----------------------- plain-JAX reference (for checking) -----------------------
def _gat_layer_ref(h, adj, W, a_src, a_dst, heads, dout, concat):
    n = h.shape[0]
    z = (h @ W).reshape(n, heads, dout)
    e_s = jnp.einsum('nhd,hd->nh', z, a_src)
    e_d = jnp.einsum('nhd,hd->nh', z, a_dst)
    logit = e_d[:, None, :] + e_s[None, :, :]          # [dst, src, h]
    logit = jnp.where(logit > 0, logit, 0.2 * logit)
    logit = jnp.where(adj[:, :, None] > 0, logit, -1e30)
    m = logit.max(axis=1, keepdims=True)
    p = jnp.exp(logit - m) * adj[:, :, None]
    alpha = p / p.sum(axis=1, keepdims=True)
    out = jnp.einsum('dsh,shk->dhk', alpha, z)
    if concat:
        return out.reshape(n, heads * dout)
    return out.mean(axis=1)


def gat_ref(x, edge_idx, params, *, nheads, nhid, nclass):
    n = x.shape[0]
    d1 = nhid // nheads
    adj = edge_index_to_adj(edge_idx, n)
    h1 = _gat_layer_ref(x, adj, params["w1"], params["as1"], params["ad1"],
                        nheads, d1, True) + params["b1"]
    h1 = jax.nn.relu(h1)
    h2 = _gat_layer_ref(h1, adj, params["w2"], params["as2"], params["ad2"],
                        nheads, nclass, False) + params["b2"]
    return jax.nn.log_softmax(h2, axis=1)


# ----------------------- deterministic parameter init -----------------------
def init_params(key, nfeat, nhid, nclass, nheads):
    d1 = nhid // nheads
    ks = jax.random.split(key, 8)

    def scaled(k, shape, fan_in):
        return jax.random.normal(k, shape, jnp.float32) / jnp.sqrt(jnp.float32(fan_in))

    return dict(
        w1=scaled(ks[0], (nfeat, nheads * d1), nfeat),       # GATConv.lin weight (no bias)
        as1=scaled(ks[1], (nheads, d1), d1),                 # att_src
        ad1=scaled(ks[2], (nheads, d1), d1),                 # att_dst
        b1=0.1 * scaled(ks[3], (1, nheads * d1), 1.0),       # bias (concat=True -> H*d1)
        w2=scaled(ks[4], (nhid, nheads * nclass), nhid),
        as2=scaled(ks[5], (nheads, nclass), nclass),
        ad2=scaled(ks[6], (nheads, nclass), nclass),
        b2=0.1 * scaled(ks[7], (1, nclass), 1.0),            # bias (concat=False -> nclass)
    )


if __name__ == "__main__":
    N, NFEAT, NHID, NCLASS, NHEADS = 32, 64, 64, 8, 8
    key = jax.random.PRNGKey(0)
    kx, kp = jax.random.split(key)

    x = jax.random.normal(kx, (N, NFEAT), jnp.float32)
    # deterministic small graph: i -> (i+1)%N and i -> (i+3)%N  (E = 64 edges)
    src = jnp.concatenate([jnp.arange(N), jnp.arange(N)])
    dst = jnp.concatenate([(jnp.arange(N) + 1) % N, (jnp.arange(N) + 3) % N])
    edge_idx = jnp.stack([src, dst]).astype(jnp.int32)       # [2, E]

    params = init_params(kp, NFEAT, NHID, NCLASS, NHEADS)
    ref = gat_ref(x, edge_idx, params, nheads=NHEADS, nhid=NHID, nclass=NCLASS)

    # f32 compute path
    out = gat_forward(x, edge_idx, params, nheads=NHEADS, nhid=NHID, nclass=NCLASS)
    out = jax.block_until_ready(out)
    assert out.shape == (N, NCLASS), out.shape
    assert out.dtype == jnp.float32
    assert bool(jnp.all(jnp.isfinite(out)))
    assert bool(jnp.allclose(out, ref, atol=2e-3, rtol=2e-3)), \
        float(jnp.max(jnp.abs(out - ref)))

    # bf16 MXU-operand path (safe on v5e/v6e/v7x): matmul inputs + z storage in bf16,
    # f32 accumulation; softmax/mask math stays f32.
    out_bf16 = gat_forward(x, edge_idx, params, nheads=NHEADS, nhid=NHID,
                           nclass=NCLASS, compute_dtype=jnp.bfloat16)
    out_bf16 = jax.block_until_ready(out_bf16)
    assert out_bf16.shape == (N, NCLASS)
    assert bool(jnp.all(jnp.isfinite(out_bf16)))
    assert bool(jnp.allclose(out_bf16, ref, atol=1e-1, rtol=1e-1)), \
        float(jnp.max(jnp.abs(out_bf16 - ref)))

    print("KERNEL_OK")
</pallas_src>

<mosaic_0001>
module attributes {stable_mosaic.version = 11 : i64} {
  func.func @_project_kernel(%arg0: i32, %arg1: memref<128x64xf32, #tpu.memory_space<vmem>>, %arg2: memref<64x128xf32, #tpu.memory_space<vmem>>, %arg3: memref<1x128xf32, #tpu.memory_space<vmem>>, %arg4: memref<128x128xf32, #tpu.memory_space<vmem>>, %arg5: memref<8x128xf32, #tpu.memory_space<vmem>>, %arg6: memref<128x128xf32, #tpu.memory_space<vmem>>, %arg7: memref<128x128xf32, #tpu.memory_space<vmem>>, %arg8: memref<8x128xf32, #tpu.memory_space<vmem>>) attributes {dimension_semantics = [#tpu.dimension_semantics<parallel>], iteration_bounds = array<i64: 1>, scalar_prefetch = 0 : i64, scratch_operands = 0 : i64, tpu.core_type = #tpu.core_type<tc>, window_params = [{transform_indices = @transform_0, window_bounds = array<i64: 128, 64>}, {pipeline_mode = #tpu.pipeline_mode<synchronous>, transform_indices = @transform_1, window_bounds = array<i64: 64, 128>}, {pipeline_mode = #tpu.pipeline_mode<synchronous>, transform_indices = @transform_2, window_bounds = array<i64: 1, 128>}, {pipeline_mode = #tpu.pipeline_mode<synchronous>, transform_indices = @transform_3, window_bounds = array<i64: 128, 128>}, {pipeline_mode = #tpu.pipeline_mode<synchronous>, transform_indices = @transform_4, window_bounds = array<i64: 8, 128>}, {transform_indices = @transform_5, window_bounds = array<i64: 128, 128>}, {transform_indices = @transform_6, window_bounds = array<i64: 128, 128>}, {transform_indices = @transform_7, window_bounds = array<i64: 8, 128>}]} {
    %c0 = arith.constant 0 : index
    %c0_0 = arith.constant 0 : index
    %0 = vector.load %arg1[%c0, %c0_0] : memref<128x64xf32, #tpu.memory_space<vmem>>, vector<128x64xf32>
    %c0_1 = arith.constant 0 : index
    %c0_2 = arith.constant 0 : index
    %1 = vector.load %arg2[%c0_1, %c0_2] : memref<64x128xf32, #tpu.memory_space<vmem>>, vector<64x128xf32>
    %cst = arith.constant dense<0.000000e+00> : vector<128x128xf32>
    %2 = tpu.matmul %0, %1, %cst {dimension_numbers = #tpu.dot_dimension_numbers<[1], [0], [0], [1], [0, 0, 1, 1], [], []>} : vector<128x64xf32>, vector<64x128xf32>, vector<128x128xf32> -> vector<128x128xf32>
    %c0_3 = arith.constant 0 : index
    %c0_4 = arith.constant 0 : index
    %3 = vector.load %arg3[%c0_3, %c0_4] : memref<1x128xf32, #tpu.memory_space<vmem>>, vector<1x128xf32>
    %4 = vector.broadcast %3 : vector<1x128xf32> to vector<128x128xf32>
    %5 = arith.addf %2, %4 : vector<128x128xf32>
    %c0_5 = arith.constant 0 : index
    %c0_6 = arith.constant 0 : index
    %6 = vector.load %arg6[%c0_5, %c0_6] : memref<128x128xf32, #tpu.memory_space<vmem>>, vector<128x128xf32>
    tpu.vector_store %arg6[%c0_5, %c0_6], %5 {strides = array<i32>} : memref<128x128xf32, #tpu.memory_space<vmem>>, vector<128x128xf32>,
    %c0_7 = arith.constant 0 : index
    %c0_8 = arith.constant 0 : index
    %7 = vector.load %arg4[%c0_7, %c0_8] : memref<128x128xf32, #tpu.memory_space<vmem>>, vector<128x128xf32>
    %cst_9 = arith.constant dense<0.000000e+00> : vector<128x128xf32>
    %8 = tpu.matmul %2, %7, %cst_9 {dimension_numbers = #tpu.dot_dimension_numbers<[1], [0], [0], [1], [0, 0, 1, 1], [], []>} : vector<128x128xf32>, vector<128x128xf32>, vector<128x128xf32> -> vector<128x128xf32>
    %c0_10 = arith.constant 0 : index
    %c0_11 = arith.constant 0 : index
    %9 = vector.load %arg7[%c0_10, %c0_11] : memref<128x128xf32, #tpu.memory_space<vmem>>, vector<128x128xf32>
    tpu.vector_store %arg7[%c0_10, %c0_11], %8 {strides = array<i32>} : memref<128x128xf32, #tpu.memory_space<vmem>>, vector<128x128xf32>,
    %c0_12 = arith.constant 0 : index
    %c0_13 = arith.constant 0 : index
    %10 = vector.load %arg5[%c0_12, %c0_13] : memref<8x128xf32, #tpu.memory_space<vmem>>, vector<8x128xf32>
    %cst_14 = arith.constant dense<0.000000e+00> : vector<8x128xf32>
    %11 = tpu.matmul %10, %2, %cst_14 {dimension_numbers = #tpu.dot_dimension_numbers<[1], [1], [0], [0], [0, 0, 1, 0], [], []>} : vector<8x128xf32>, vector<128x128xf32>, vector<8x128xf32> -> vector<8x128xf32>
    %c0_15 = arith.constant 0 : index
    %c0_16 = arith.constant 0 : index
    %12 = vector.load %arg8[%c0_15, %c0_16] : memref<8x128xf32, #tpu.memory_space<vmem>>, vector<8x128xf32>
    tpu.vector_store %arg8[%c0_15, %c0_16], %11 {strides = array<i32>} : memref<8x128xf32, #tpu.memory_space<vmem>>, vector<8x128xf32>,
    return
  }
  func.func @transform_0(%arg0: i32) -> (i32, i32) {
    %c0_i32 = arith.constant 0 : i32
    %c0_i32_0 = arith.constant 0 : i32
    return %arg0, %c0_i32 : i32, i32
  }
  func.func @transform_1(%arg0: i32) -> (i32, i32) {
    %c0_i32 = arith.constant 0 : i32
    %c0_i32_0 = arith.constant 0 : i32
    %c0_i32_1 = arith.constant 0 : i32
    return %c0_i32, %c0_i32_0 : i32, i32
  }
  func.func @transform_2(%arg0: i32) -> (i32, i32) {
    %c0_i32 = arith.constant 0 : i32
    %c0_i32_0 = arith.constant 0 : i32
    %c0_i32_1 = arith.constant 0 : i32
    return %c0_i32, %c0_i32_0 : i32, i32
  }
  func.func @transform_3(%arg0: i32) -> (i32, i32) {
    %c0_i32 = arith.constant 0 : i32
    %c0_i32_0 = arith.constant 0 : i32
    %c0_i32_1 = arith.constant 0 : i32
    return %c0_i32, %c0_i32_0 : i32, i32
  }
  func.func @transform_4(%arg0: i32) -> (i32, i32) {
    %c0_i32 = arith.constant 0 : i32
    %c0_i32_0 = arith.constant 0 : i32
    %c0_i32_1 = arith.constant 0 : i32
    return %c0_i32, %c0_i32_0 : i32, i32
  }
  func.func @transform_5(%arg0: i32) -> (i32, i32) {
    %c0_i32 = arith.constant 0 : i32
    %c0_i32_0 = arith.constant 0 : i32
    return %arg0, %c0_i32 : i32, i32
  }
  func.func @transform_6(%arg0: i32) -> (i32, i32) {
    %c0_i32 = arith.constant 0 : i32
    %c0_i32_0 = arith.constant 0 : i32
    return %arg0, %c0_i32 : i32, i32
  }
  func.func @transform_7(%arg0: i32) -> (i32, i32) {
    %c0_i32 = arith.constant 0 : i32
    %c0_i32_0 = arith.constant 0 : i32
    return %c0_i32, %arg0 : i32, i32
  }
}

</mosaic_0001>

<bundles_post_ra>
// kernel: tpu_custom_call.1
= control target key start
LH: loop header
LB: loop body
LE: loop exit
PB: predicated region body
PF: predicated region fallthrough
CT: control target
= control target key end

     0   :  { %13 = vsyncpa [#allocation3], 0  ;;  %vm49_vm0 = vcmask 523264   ;;  %s1205_s0 = inlined_call_operand.vmem [shape: f32[128,64], index: 0, kind: input, shape index: {}]   ;;  %s1206_s1 = inlined_call_operand.vmem [shape: f32[64,128], index: 1, kind: input, shape index: {}]   ;;  %s1207_s2 = inlined_call_operand.vmem [shape: f32[1,128], index: 2, kind: input, shape index: {}]   ;;  %s1208_s3 = inlined_call_operand.vmem [shape: f32[128,128], index: 3, kind: input, shape index: {}]   ;;  %s1209_s4 = inlined_call_operand.vmem [shape: f32[8,128], index: 4, kind: input, shape index: {}]   ;;  %s1210_s5 = inlined_call_operand.hbm [shape: f32[128,128], index: 5, kind: output, shape index: {0}]   ;;  %s1211_s6 = inlined_call_operand.hbm [shape: f32[128,128], index: 6, kind: output, shape index: {1}]   ;;  %s1212_s7 = inlined_call_operand.hbm [shape: f32[8,128], index: 7, kind: output, shape index: {2}]  }
   0x1   :  { %v41_v0 = vld [vmem:[%s1206_s1] sm:$0xff]  ;;  %v42_v1 = vld [vmem:[%s1206_s1 + $0x8] sm:$0xff]  ;;  %v43_v2 = vld [vmem:[%s1206_s1 + $0x10] sm:$0xff] }
   0x2   :  { %v797_v3 = vpack.c.bf16 %v42_v1, %v41_v0  ;;  %v44_v4 = vld [vmem:[%s1206_s1 + $0x18] sm:$0xff]  ;;  %v45_v6 = vld [vmem:[%s1206_s1 + $0x20] sm:$0xff]  ;;  %v46_v7 = vld [vmem:[%s1206_s1 + $0x28] sm:$0xff] }
   0x3   :  { %v801_v5 = vpack.c.bf16 %v44_v4, %v43_v2  ;;  %v25_v8 = vld [vmem:[%s1205_s0] sm:$0xff]  ;;  %v805_v9 = vpack.c.bf16 %v46_v7, %v45_v6  ;;  %v47_v10 = vld [vmem:[%s1206_s1 + $0x30] sm:$0xff]  ;;  %v48_v11 = vld [vmem:[%s1206_s1 + $0x38] sm:$0xff] }
   0x4   :  { %798 = vmatprep.subr.bf16.mxu1 %v797_v3  ;;  %682 = vmatprep.mubr.msk.f32.mxu1 %vm49_vm0, %v25_v8  ;;  %v809_v12 = vpack.c.bf16 %v48_v11, %v47_v10  ;;  %v282_v13 = vld [vmem:[%s1208_s3] sm:$0xff]  ;;  %v283_v14 = vld [vmem:[%s1208_s3 + $0x8] sm:$0xff] }
   0x5   :  { %800 = vmatpush3.bf16.msra.mxu1 %v797_v3  ;;  %v813_v15 = vpack.c.bf16 %v283_v14, %v282_v13 }
   0x6   :  { %802 = vmatprep.subr.bf16.mxu1 %v801_v5 }
   0x9   :  { %804 = vmatpush3.bf16.msra.mxu1 %v801_v5 }
   0xa   :  { %806 = vmatprep.subr.bf16.mxu1 %v805_v9 }
   0xd   :  { %808 = vmatpush3.bf16.msra.mxu1 %v805_v9 }
   0xe   :  { %810 = vmatprep.subr.bf16.mxu1 %v809_v12 }
   0xf   :  { %14 = vsyncpa [#allocation5], 0  ;;  %v284_v16 = vld [vmem:[%s1208_s3 + $0x10] sm:$0xff]  ;;  %v285_v17 = vld [vmem:[%s1208_s3 + $0x18] sm:$0xff]  ;;  %v947_v52 = vmov 0.0|0.0   ;;  %vm948_vm1 = vmmov 0  }
  0x10   :  { %v26_v18 = vld [vmem:[%s1205_s0 + $0x8] sm:$0xff]  ;;  %v27_v19 = vld [vmem:[%s1205_s0 + $0x10] sm:$0xff]  ;;  %v817_v20 = vpack.c.bf16 %v285_v17, %v284_v16  ;;  %v286_v21 = vld [vmem:[%s1208_s3 + $0x20] sm:$0xff]  ;;  %845 = vmatprep.subr.bf16.mxu0 %v947_v52  ;;  %v949_v53 = vmov 0.0   ;;  %s950_s10 = smov [#allocation2]  }
  0x11   :  { %812 = vmatpush3.bf16.msra.mxu1 %v809_v12  ;;  %v287_v22 = vld [vmem:[%s1208_s3 + $0x28] sm:$0xff]  ;;  %v28_v23 = vld [vmem:[%s1205_s0 + $0x18] sm:$0xff]  ;;  %v29_v24 = vld [vmem:[%s1205_s0 + $0x20] sm:$0xff]  ;;  %794 = vmatprep.mubr.msk.f32.mxu0 %vm948_vm1, %v949_v53  ;;  %s536_s11 = sshll.u32 %s950_s10, 4  ;;  %s537_s11 = int_to_ptr.vmem [resolvable:$true] %s536_s11 }
  0x12   :  { %814 = vmatprep.subr.bf16.mxu1 %v813_v15  ;;  %v821_v25 = vpack.c.bf16 %v287_v22, %v286_v21  ;;  %v288_v26 = vld [vmem:[%s1208_s3 + $0x30] sm:$0xff]  ;;  %v289_v27 = vld [vmem:[%s1208_s3 + $0x38] sm:$0xff]  ;;  %v30_v28 = vld [vmem:[%s1205_s0 + $0x28] sm:$0xff]  ;;  %s877_s12 = scalar_lea.vmem %s537_s11, 2048  ;;  %p882_p1 = scmp.lt.s32.totalorder %s537_s11, %s537_s11 }
  0x13   :  { %v31_v29 = vld [vmem:[%s1205_s0 + $0x30] sm:$0xff]  ;;  %v825_v30 = vpack.c.bf16 %v289_v27, %v288_v26  ;;  %v290_v31 = vld [vmem:[%s1208_s3 + $0x40] sm:$0xff]  ;;  %v291_v32 = vld [vmem:[%s1208_s3 + $0x48] sm:$0xff]  ;;  %p878_p0 = scmp.ne.s32.totalorder %s537_s11, %s877_s12  ;;  %p883_p2 = scmp.lt.s32.totalorder %s877_s12, %s877_s12 }
  0x14   :  { %683 = vmatmul.mubr.msk.f32.vlgmr.msra.gmra.mrb[0].mxu1 %vm49_vm0, %v26_v18  ;;  %v32_v33 = vld [vmem:[%s1205_s0 + $0x38] sm:$0xff]  ;;  %v33_v34 = vld [vmem:[%s1205_s0 + $0x40] sm:$0xff]  ;;  %v829_v35 = vpack.c.bf16 %v291_v32, %v290_v31  ;;  %v292_v36 = vld [vmem:[%s1208_s3 + $0x50] sm:$0xff] }
  0x15   :  { %685 = vmatprep.mubr.msk.f32.mxu1 %vm49_vm0, %v27_v19  ;;  %816 = vmatpush3.bf16.msra.mxu1 %v813_v15  ;;  %v293_v37 = vld [vmem:[%s1208_s3 + $0x58] sm:$0xff]  ;;  %v34_v38 = vld [vmem:[%s1205_s0 + $0x48] sm:$0xff]  ;;  %v35_v39 = vld [vmem:[%s1205_s0 + $0x50] sm:$0xff]  ;;  %p884_p3 = por %p883_p2, %p882_p1 }
  0x16   :  { %818 = vmatprep.subr.bf16.mxu1 %v817_v20  ;;  %v833_v40 = vpack.c.bf16 %v293_v37, %v292_v36  ;;  %v294_v41 = vld [vmem:[%s1208_s3 + $0x60] sm:$0xff]  ;;  %v295_v42 = vld [vmem:[%s1208_s3 + $0x68] sm:$0xff]  ;;  %v36_v43 = vld [vmem:[%s1205_s0 + $0x58] sm:$0xff] }
  0x17   :  { %v37_v44 = vld [vmem:[%s1205_s0 + $0x60] sm:$0xff]  ;;  %v837_v45 = vpack.c.bf16 %v295_v42, %v294_v41  ;;  %v296_v46 = vld [vmem:[%s1208_s3 + $0x70] sm:$0xff]  ;;  %v297_v47 = vld [vmem:[%s1208_s3 + $0x78] sm:$0xff]  ;;  %p885_p4 = pnand %p884_p3, %p878_p0 }
  0x18   :  { %686 = vmatmul.mubr.msk.f32.gmra.mrb[2].mxu1 %vm49_vm0, %v28_v23  ;;  %v38_v48 = vld [vmem:[%s1205_s0 + $0x68] sm:$0xff]  ;;  %v39_v49 = vld [vmem:[%s1205_s0 + $0x70] sm:$0xff]  ;;  %v841_v50 = vpack.c.bf16 %v297_v47, %v296_v46  ;;  %v40_v51 = vld [vmem:[%s1205_s0 + $0x78] sm:$0xff] }
  0x19   :  { %688 = vmatprep.mubr.msk.f32.mxu1 %vm49_vm0, %v29_v24  ;;  %820 = vmatpush3.bf16.msra.mxu1 %v817_v20  ;;  %v1135_v54 = vld [vmem:[%s1207_s2] ss:$0 sm:$0xff] }
  0x1a   :  { %822 = vmatprep.subr.bf16.mxu1 %v821_v25  ;;  %v459_v31 = vld [vmem:[%s1209_s4] sm:$0xff] }
  0x1c   :  { %689 = vmatmul.mubr.msk.f32.gmra.mrb[4].mxu1 %vm49_vm0, %v30_v28 }
  0x1d   :  { %691 = vmatprep.mubr.msk.f32.mxu1 %vm49_vm0, %v31_v29  ;;  %824 = vmatpush3.bf16.msra.mxu1 %v821_v25 }
  0x1e   :  { %826 = vmatprep.subr.bf16.mxu1 %v825_v30 }
  0x20   :  { %692 = vmatmul.mubr.msk.f32.gmra.mrb[6].mxu1 %vm49_vm0, %v32_v33 }
  0x21   :  { %694 = vmatprep.mubr.msk.f32.mxu1 %vm49_vm0, %v33_v34  ;;  %828 = vmatpush3.bf16.msra.mxu1 %v825_v30 }
  0x22   :  { %830 = vmatprep.subr.bf16.mxu1 %v829_v35 }
  0x24   :  { %695 = vmatmul.mubr.msk.f32.gmra.mrb[8].mxu1 %vm49_vm0, %v34_v38 }
  0x25   :  { %697 = vmatprep.mubr.msk.f32.mxu1 %vm49_vm0, %v35_v39  ;;  %832 = vmatpush3.bf16.msra.mxu1 %v829_v35 }
  0x26   :  { %834 = vmatprep.subr.bf16.mxu1 %v833_v40 }
  0x28   :  { %698 = vmatmul.mubr.msk.f32.gmra.mrb[10].mxu1 %vm49_vm0, %v36_v43 }
  0x29   :  { %700 = vmatprep.mubr.msk.f32.mxu1 %vm49_vm0, %v37_v44  ;;  %836 = vmatpush3.bf16.msra.mxu1 %v833_v40 }
  0x2a   :  { %838 = vmatprep.subr.bf16.mxu1 %v837_v45 }
  0x2c   :  { %701 = vmatmul.mubr.msk.f32.gmra.mrb[12].mxu1 %vm49_vm0, %v38_v48 }
  0x2d   :  { %703 = vmatprep.mubr.msk.f32.mxu1 %vm49_vm0, %v39_v49  ;;  %840 = vmatpush3.bf16.msra.mxu1 %v837_v45 }
  0x2e   :  { %842 = vmatprep.subr.bf16.mxu1 %v841_v50 }
  0x30   :  { %704 = vmatmul.mubr.msk.f32.gmra.mrb[14].mxu1 %vm49_vm0, %v40_v51 }
  0x31   :  { %844 = vmatpush3.bf16.msra.mxu1 %v841_v50 }
  0xe7   :  { %v684_v55 = vpop.f32.mrb[0].mxu1 }
  0xe8   :  { %v251_v56 = vadd.f32 %v684_v55, %v1135_v54  ;;  %v164_v57 = vpop.f32.mrb[1].mxu1 }
  0xe9   :  { %v250_v58 = vadd.f32 %v1135_v54, %v164_v57  ;;  %738 = vmatprep.mubr.f32.mxu1 %v164_v57  ;;  %v846_v59 = vpack.c.bf16 %v684_v55, %v164_v57 }
  0xea   :  { %267 = vst [vmem:[#allocation2 + $0x8] sm:$0xff] %v251_v56  ;;  %739 = vmatmul.mubr.f32.vlgmr.msra.gmra.mrb[16].mxu1 %v684_v55 }
  0xeb   :  { %266 = vst [vmem:[#allocation2] sm:$0xff] %v250_v58  ;;  %847 = vmatpush3.bf16.xpose.msra.mxu0 %v846_v59  ;;  %v687_v60 = vpop.f32.mrb[2].mxu1 }
  0xec   :  { %v253_v61 = vadd.f32 %v687_v60, %v1135_v54  ;;  %v174_v62 = vpop.f32.mrb[3].mxu1  ;;  %848 = vmatprep.subr.bf16.mxu0 %v947_v52 }
  0xed   :  { %v252_v63 = vadd.f32 %v1135_v54, %v174_v62  ;;  %v849_v0 = vpack.c.bf16 %v687_v60, %v174_v62  ;;  %741 = vmatprep.mubr.f32.mxu1 %v174_v62 }
  0xee   :  { %269 = vst [vmem:[#allocation2 + $0x18] sm:$0xff] %v253_v61  ;;  %742 = vmatmul.mubr.f32.gmra.mrb[18].mxu1 %v687_v60 }
  0xef   :  { %268 = vst [vmem:[#allocation2 + $0x10] sm:$0xff] %v252_v63  ;;  %v690_v1 = vpop.f32.mrb[4].mxu1 }
  0xf0   :  { %v255_v2 = vadd.f32 %v690_v1, %v1135_v54  ;;  %v184_v3 = vpop.f32.mrb[5].mxu1 }
  0xf1   :  { %v254_v4 = vadd.f32 %v1135_v54, %v184_v3  ;;  %v852_v5 = vpack.c.bf16 %v690_v1, %v184_v3  ;;  %744 = vmatprep.mubr.f32.mxu1 %v184_v3 }
  0xf2   :  { %271 = vst [vmem:[#allocation2 + $0x28] sm:$0xff] %v255_v2  ;;  %745 = vmatmul.mubr.f32.gmra.mrb[20].mxu1 %v690_v1 }
  0xf3   :  { %850 = vmatpush3.bf16.xpose.msra.mxu0 %v849_v0  ;;  %270 = vst [vmem:[#allocation2 + $0x20] sm:$0xff] %v254_v4  ;;  %v693_v6 = vpop.f32.mrb[6].mxu1 }
  0xf4   :  { %851 = vmatprep.subr.bf16.mxu0 %v947_v52  ;;  %v257_v7 = vadd.f32 %v693_v6, %v1135_v54  ;;  %v194_v8 = vpop.f32.mrb[7].mxu1 }
  0xf5   :  { %v256_v9 = vadd.f32 %v1135_v54, %v194_v8  ;;  %v855_v10 = vpack.c.bf16 %v693_v6, %v194_v8  ;;  %747 = vmatprep.mubr.f32.mxu1 %v194_v8 }
  0xf6   :  { %273 = vst [vmem:[#allocation2 + $0x38] sm:$0xff] %v257_v7  ;;  %748 = vmatmul.mubr.f32.gmra.mrb[22].mxu1 %v693_v6 }
  0xf7   :  { %272 = vst [vmem:[#allocation2 + $0x30] sm:$0xff] %v256_v9  ;;  %v696_v11 = vpop.f32.mrb[8].mxu1 }
  0xf8   :  { %v259_v12 = vadd.f32 %v696_v11, %v1135_v54  ;;  %v204_v13 = vpop.f32.mrb[9].mxu1 }
  0xf9   :  { %v258_v14 = vadd.f32 %v1135_v54, %v204_v13  ;;  %v858_v15 = vpack.c.bf16 %v696_v11, %v204_v13  ;;  %750 = vmatprep.mubr.f32.mxu1 %v204_v13 }
  0xfa   :  { %275 = vst [vmem:[#allocation2 + $0x48] sm:$0xff] %v259_v12  ;;  %751 = vmatmul.mubr.f32.gmra.mrb[24].mxu1 %v696_v11 }
  0xfb   :  { %853 = vmatpush3.bf16.xpose.msra.mxu0 %v852_v5  ;;  %274 = vst [vmem:[#allocation2 + $0x40] sm:$0xff] %v258_v14  ;;  %v699_v16 = vpop.f32.mrb[10].mxu1 }
  0xfc   :  { %854 = vmatprep.subr.bf16.mxu0 %v947_v52  ;;  %v261_v17 = vadd.f32 %v699_v16, %v1135_v54  ;;  %v214_v18 = vpop.f32.mrb[11].mxu1 }
  0xfd   :  { %v260_v19 = vadd.f32 %v1135_v54, %v214_v18  ;;  %v861_v20 = vpack.c.bf16 %v699_v16, %v214_v18  ;;  %753 = vmatprep.mubr.f32.mxu1 %v214_v18 }
  0xfe   :  { %277 = vst [vmem:[#allocation2 + $0x58] sm:$0xff] %v261_v17  ;;  %754 = vmatmul.mubr.f32.gmra.mrb[26].mxu1 %v699_v16 }
  0xff   :  { %276 = vst [vmem:[#allocation2 + $0x50] sm:$0xff] %v260_v19  ;;  %v702_v21 = vpop.f32.mrb[12].mxu1 }
 0x100   :  { %v263_v22 = vadd.f32 %v702_v21, %v1135_v54  ;;  %v224_v23 = vpop.f32.mrb[13].mxu1 }
 0x101   :  { %v262_v24 = vadd.f32 %v1135_v54, %v224_v23  ;;  %v864_v25 = vpack.c.bf16 %v702_v21, %v224_v23  ;;  %756 = vmatprep.mubr.f32.mxu1 %v224_v23 }
 0x102   :  { %279 = vst [vmem:[#allocation2 + $0x68] sm:$0xff] %v263_v22  ;;  %757 = vmatmul.mubr.f32.gmra.mrb[28].mxu1 %v702_v21 }
 0x103   :  { %856 = vmatpush3.bf16.xpose.msra.mxu0 %v855_v10  ;;  %278 = vst [vmem:[#allocation2 + $0x60] sm:$0xff] %v262_v24  ;;  %v705_v26 = vpop.f32.mrb[14].mxu1 }
 0x104   :  { %857 = vmatprep.subr.bf16.mxu0 %v947_v52  ;;  %v265_v27 = vadd.f32 %v705_v26, %v1135_v54  ;;  %v234_v28 = vpop.f32.mrb[15].mxu1 }
 0x105   :  { %v264_v29 = vadd.f32 %v1135_v54, %v234_v28  ;;  %v867_v30 = vpack.c.bf16 %v705_v26, %v234_v28  ;;  %759 = vmatprep.mubr.f32.mxu1 %v234_v28 }
 0x106   :  { %281 = vst [vmem:[#allocation2 + $0x78] sm:$0xff] %v265_v27  ;;  %760 = vmatmul.mubr.f32.gmra.mrb[30].mxu1 %v705_v26 }
 0x107   :  { %280 = vst [vmem:[#allocation2 + $0x70] sm:$0xff] %v264_v29 }
 0x10b   :  { %859 = vmatpush3.bf16.xpose.msra.mxu0 %v858_v15 }
 0x10c   :  { %860 = vmatprep.subr.bf16.mxu0 %v947_v52 }
 0x113   :  { %862 = vmatpush3.bf16.xpose.msra.mxu0 %v861_v20 }
 0x114   :  { %863 = vmatprep.subr.bf16.mxu0 %v947_v52 }
 0x11b   :  { %865 = vmatpush3.bf16.xpose.msra.mxu0 %v864_v25 }
 0x11c   :  { %866 = vmatprep.subr.bf16.mxu0 %v947_v52 }
 0x123   :  { %868 = vmatpush3.bf16.xpose.msra.mxu0 %v867_v30 }
 0x12a   :  { %795 = vmatmul.mubr.f32.vlgmr.msra.gmra.mrb[0].mxu0 %v459_v31 }
 0x12b   :  { %888 = shalt.err (!%p885_p4)
}
 0x12c   :  { %s889_s15 = scalar_lea.hbm %s1210_s5, 2048 }
 0x12d   :  { %p890_p5 = scmp.ne.s32.totalorder %s1210_s5, %s889_s15  ;;  %p893_p6 = scmp.lt.u32.totalorder %s889_s15, %s1210_s5 }
 0x12f   :  { %p895_p7 = pnand %p893_p6, %p890_p5 }
 0x131   :  { %898 = shalt.err (!%p895_p7)
}
 0x132   :  { %s951_s19 = smov 128   ;;  %s952_s20 = smov 8  }
 0x133   :  { %542 = dma.vmem_to_hbm [thread:$0]  %s537_s11, 2048, %s1210_s5, [#allocation3], %s951_s19, %s951_s19, %s952_s20  }
 0x134   :  { %s953_s5 = smov [#allocation4]  }
 0x135   :  { %s548_s23 = sshll.u32 %s953_s5, 4  ;;  %s549_s23 = int_to_ptr.vmem [resolvable:$true] %s548_s23 }
 0x136   :  { %s899_s24 = scalar_lea.vmem %s549_s23, 2048  ;;  %p904_p9 = scmp.lt.s32.totalorder %s549_s23, %s549_s23 }
 0x137   :  { %p900_p8 = scmp.ne.s32.totalorder %s549_s23, %s899_s24  ;;  %p905_p10 = scmp.lt.s32.totalorder %s899_s24, %s899_s24 }
 0x139   :  { %p906_p11 = por %p905_p10, %p904_p9 }
 0x13b   :  { %p907_p12 = pnand %p906_p11, %p900_p8 }
 0x1bd   :  { %v740_v32 = vpop.f32.mrb[16].mxu1 }
 0x1be   :  { %444 = vst [vmem:[#allocation4 + $0x8] sm:$0xff] %v740_v32  ;;  %v364_v33 = vpop.f32.mrb[17].mxu1 }
 0x1bf   :  { %443 = vst [vmem:[#allocation4] sm:$0xff] %v364_v33 }
 0x1c1   :  { %v743_v34 = vpop.f32.mrb[18].mxu1 }
 0x1c2   :  { %446 = vst [vmem:[#allocation4 + $0x18] sm:$0xff] %v743_v34  ;;  %v374_v35 = vpop.f32.mrb[19].mxu1 }
 0x1c3   :  { %445 = vst [vmem:[#allocation4 + $0x10] sm:$0xff] %v374_v35 }
 0x1c5   :  { %v746_v36 = vpop.f32.mrb[20].mxu1 }
 0x1c6   :  { %448 = vst [vmem:[#allocation4 + $0x28] sm:$0xff] %v746_v36  ;;  %v384_v37 = vpop.f32.mrb[21].mxu1 }
 0x1c7   :  { %447 = vst [vmem:[#allocation4 + $0x20] sm:$0xff] %v384_v37 }
 0x1c9   :  { %v749_v38 = vpop.f32.mrb[22].mxu1 }
 0x1ca   :  { %450 = vst [vmem:[#allocation4 + $0x38] sm:$0xff] %v749_v38  ;;  %v394_v39 = vpop.f32.mrb[23].mxu1 }
 0x1cb   :  { %449 = vst [vmem:[#allocation4 + $0x30] sm:$0xff] %v394_v39 }
 0x1cd   :  { %v752_v40 = vpop.f32.mrb[24].mxu1 }
 0x1ce   :  { %452 = vst [vmem:[#allocation4 + $0x48] sm:$0xff] %v752_v40  ;;  %v404_v41 = vpop.f32.mrb[25].mxu1 }
 0x1cf   :  { %451 = vst [vmem:[#allocation4 + $0x40] sm:$0xff] %v404_v41 }
 0x1d1   :  { %v755_v42 = vpop.f32.mrb[26].mxu1 }
 0x1d2   :  { %454 = vst [vmem:[#allocation4 + $0x58] sm:$0xff] %v755_v42  ;;  %v414_v43 = vpop.f32.mrb[27].mxu1 }
 0x1d3   :  { %453 = vst [vmem:[#allocation4 + $0x50] sm:$0xff] %v414_v43 }
 0x1d5   :  { %v758_v44 = vpop.f32.mrb[28].mxu1 }
 0x1d6   :  { %456 = vst [vmem:[#allocation4 + $0x68] sm:$0xff] %v758_v44  ;;  %v424_v45 = vpop.f32.mrb[29].mxu1 }
 0x1d7   :  { %455 = vst [vmem:[#allocation4 + $0x60] sm:$0xff] %v424_v45 }
 0x1d9   :  { %v761_v46 = vpop.f32.mrb[30].mxu1 }
 0x1da   :  { %458 = vst [vmem:[#allocation4 + $0x78] sm:$0xff] %v761_v46  ;;  %v434_v47 = vpop.f32.mrb[31].mxu1 }
 0x1db   :  { %457 = vst [vmem:[#allocation4 + $0x70] sm:$0xff] %v434_v47 }
 0x1dc   :  { %910 = shalt.err (!%p907_p12)
}
 0x1dd   :  { %s911_s26 = scalar_lea.hbm %s1211_s6, 2048 }
 0x1de   :  { %p912_p13 = scmp.ne.s32.totalorder %s1211_s6, %s911_s26  ;;  %p915_p0 = scmp.lt.u32.totalorder %s911_s26, %s1211_s6 }
 0x1e0   :  { %p917_p1 = pnand %p915_p0, %p912_p13 }
 0x1e2   :  { %920 = shalt.err (!%p917_p1)
}
 0x1e3   :  { %554 = dma.vmem_to_hbm [thread:$0]  %s549_s23, 2048, %s1211_s6, [#allocation5], %s951_s19, %s951_s19, %s952_s20  }
 0x1e4   :  { %s954_s9 = smov [#allocation6]  }
 0x1e5   :  { %s561_s0 = sshll.u32 %s954_s9, 4  ;;  %s562_s0 = int_to_ptr.vmem [resolvable:$true] %s561_s0 }
 0x1e6   :  { %s921_s2 = scalar_lea.vmem %s562_s0, 128  ;;  %p926_p3 = scmp.lt.s32.totalorder %s562_s0, %s562_s0 }
 0x1e7   :  { %p922_p2 = scmp.ne.s32.totalorder %s562_s0, %s921_s2  ;;  %p927_p4 = scmp.lt.s32.totalorder %s921_s2, %s921_s2 }
 0x1e9   :  { %p928_p5 = por %p927_p4, %p926_p3 }
 0x1eb   :  { %p929_p6 = pnand %p928_p5, %p922_p2 }
 0x1fd   :  { %v526_v48 = vpop.f32.mrb[0].mxu0 }
 0x1fe   :  { %530 = vst [vmem:[#allocation6] sm:$0xff] %v526_v48  ;;  %v796_v49 = vpop.f32.mrb[1].mxu0 }
 0x1ff   :  { %932 = shalt.err (!%p929_p6)
}
 0x200   :  { %s933_s12 = scalar_lea.hbm %s1212_s7, 128 }
 0x201   :  { %p934_p7 = scmp.ne.s32.totalorder %s1212_s7, %s933_s12  ;;  %p937_p8 = scmp.lt.u32.totalorder %s933_s12, %s1212_s7 }
 0x203   :  { %p939_p9 = pnand %p937_p8, %p934_p7 }
 0x205   :  { %942 = shalt.err (!%p939_p9)
}
 0x206   :  { %564 = dma.vmem_to_hbm [thread:$0]  %s562_s0, 128, %s1212_s7, [#allocation5]  }
 0x207   :  { %943 = dma.done.wait [#allocation3], 2048  }
 0x208   :  { %944 = vsyncadd [#allocation3], 4294965248 }
 0x209   :  { %945 = dma.done.wait [#allocation5], 2176  }
 0x20a   :  { %946 = vsyncadd [#allocation5], 4294965120 }
 0x20b   :  { %574 = vsyncpa [#allocation3], 1 }
 0x20c   :  { %575 = vsyncpa [#allocation5], 1 }

</bundles_post_ra>
